<compile_context>
chip_gen: v6e
topology: v6e:2x2x1
jax: 0.10.0
libtpu: 0.0.40
codegen_flags: <defaults>
</compile_context>

<pallas_src>
import numpy as np
import jax
import jax.numpy as jnp
from jax import lax
from jax.experimental import pallas as pl
from jax.experimental.pallas import tpu as pltpu


_LANE = 128
_VMEM_TARGET = 32 * (1 << 20)      # per-block working-set target
_VMEM_LIMIT_CAP = 48 * (1 << 20)   # stays below v7x's 64 MiB physical VMEM
_TRI_MAX_DEFAULT = 1024            # max lane width for the MXU triangle-scan path


def _round_up(x, m):
    return ((x + m - 1) // m) * m


def _vmem_estimate(block_rows, n_lanes, in_itemsize, use_tri):
    io = 2 * 2 * block_rows * n_lanes * in_itemsize        # 2 inputs, double buffered
    tri = (2 * n_lanes * n_lanes * 2) if use_tri else 0    # bf16 triangle
    tmp = 12 * block_rows * n_lanes * 4                    # generous f32 temporaries
    return io + tri + tmp


def _vmem_limit(est):
    return int(min(max(est + (8 << 20), 32 << 20), _VMEM_LIMIT_CAP))


def _inclusive_scan_lanes_roll(posf, lane_idx):
    """Inclusive prefix sum along lanes via a Hillis-Steele pltpu.roll scan."""
    n = posf.shape[-1]
    out = posf
    shift = 1
    while shift < n:
        rolled = pltpu.roll(out, shift, axis=1)                 # out[i - shift] (circular)
        out = out + jnp.where(lane_idx >= shift, rolled, 0.0)   # mask the wrap-around
        shift *= 2
    return out


def _ndcg_terms(p_n, s_n, pos, cpos, cneg, p_total):
    """Per-position loss contributions, matching the PyTorch reference."""
    # Positive positions: (p/(k+1) - s/log2(k+1))^2, k = rank among positives.
    # Exact divides here: the difference is cancellation-sensitive.
    term_pos = (p_n / (cpos + 1.0) - s_n / jnp.log2(cpos + 1.0)) ** 2
    # Negative positions: (p/(P+1+m))^2, m = rank among negatives (approx EUP rcp OK).
    term_neg = (p_n * pl.reciprocal(p_total + 1.0 + cneg, approx=True)) ** 2
    # Unselected branch may hold inf/NaN on non-positive / padding lanes; the
    # select discards it, so no extra guard `where` is needed.
    return jnp.where(pos, term_pos, term_neg)


def _make_batched_kernel(use_tri):
    def batched_kernel(*refs):
        if use_tri:
            p_ref, s_ref, tri_ref, o_ref = refs
        else:
            p_ref, s_ref, o_ref = refs
        s = s_ref[...].astype(jnp.float32)
        p = p_ref[...].astype(jnp.float32)
        rb, nl = s.shape

        # score /= sum(score).  The reference then divides predict by
        # sum(score / sum(score)) which is exactly 1; that divide is dropped.
        s_sum = jnp.sum(s, axis=-1, keepdims=True)              # (RB, 1)
        s_n = s * pl.reciprocal(s_sum)
        p_n = p

        pos = s_n > 0.0
        posf = pos.astype(jnp.float32)
        lane = lax.broadcasted_iota(jnp.int32, (rb, nl), 1)

        if use_tri:
            # Inclusive prefix count of positives on the MXU (exact for 0/1 values).
            cpos = jnp.dot(posf.astype(jnp.bfloat16), tri_ref[...],
                           preferred_element_type=jnp.float32)
        else:
            cpos = _inclusive_scan_lanes_roll(posf, lane)

        p_total = jnp.sum(posf, axis=-1, keepdims=True)         # (RB, 1) == P
        cneg = (lane.astype(jnp.float32) + 1.0) - cpos
        contrib = _ndcg_terms(p_n, s_n, pos, cpos, cneg, p_total)

        row = jnp.sum(contrib, axis=-1, keepdims=True)          # (RB, 1)
        # Lane-dense output: transpose (RB,1) -> (1,RB) via broadcast + diagonal
        # mask + sublane reduce (avoids masked partial stores / tiny write DMAs).
        eye = (lax.broadcasted_iota(jnp.int32, (rb, rb), 0) ==
               lax.broadcasted_iota(jnp.int32, (rb, rb), 1))
        o_ref[...] = jnp.sum(jnp.where(eye, row, 0.0), axis=0, keepdims=True)
    return batched_kernel


def _make_single_kernel(use_tri):
    def single_kernel(*refs):
        if use_tri:
            p_ref, s_ref, tri_ref, o_ref = refs
        else:
            p_ref, s_ref, o_ref = refs
        s = s_ref[...].astype(jnp.float32)      # (R, C); list position = r*C + c
        p = p_ref[...].astype(jnp.float32)
        r, c = s.shape

        s_sum = jnp.sum(jnp.sum(s, axis=-1, keepdims=True), axis=0, keepdims=True)
        s_n = s * pl.reciprocal(s_sum)
        p_n = p

        pos = s_n > 0.0
        posf = pos.astype(jnp.float32)
        col = lax.broadcasted_iota(jnp.int32, (r, c), 1)

        if use_tri:
            intra = jnp.dot(posf.astype(jnp.bfloat16), tri_ref[...],
                            preferred_element_type=jnp.float32)
        else:
            intra = _inclusive_scan_lanes_roll(posf, col)

        # Exclusive cross-row carry of per-row positive counts (row-major order).
        row_tot = jnp.sum(posf, axis=-1, keepdims=True)          # (R, 1)
        ri = lax.broadcasted_iota(jnp.int32, (r, r), 0)
        rj = lax.broadcasted_iota(jnp.int32, (r, r), 1)
        row_tot_lanes = jnp.sum(jnp.where(ri == rj, row_tot, 0.0),
                                axis=0, keepdims=True)           # (1, R)
        carry = jnp.sum(jnp.where(rj < ri, row_tot_lanes, 0.0),
                        axis=-1, keepdims=True)                  # (R, 1)
        cpos = intra + carry

        p_total = jnp.sum(jnp.sum(posf, axis=-1, keepdims=True), axis=0, keepdims=True)
        pos_index = (lax.broadcasted_iota(jnp.int32, (r, c), 0) * c
                     + col).astype(jnp.float32)
        cneg = (pos_index + 1.0) - cpos
        contrib = _ndcg_terms(p_n, s_n, pos, cpos, cneg, p_total)
        o_ref[...] = jnp.sum(jnp.sum(contrib, axis=-1, keepdims=True),
                             axis=0, keepdims=True)              # (1, 1)
    return single_kernel


def ndcg_loss_batched(predict_scores, scores, *, max_block_rows=256,
                      tri_max=_TRI_MAX_DEFAULT):
    """NDCG loss for a batch of independent ranking lists.

    predict_scores, scores: (B, N).  Returns (B,) f32 per-list losses.
    """
    assert predict_scores.shape == scores.shape
    b, n = scores.shape

    in_dtype = (jnp.bfloat16 if (scores.dtype == jnp.bfloat16 and
                                 predict_scores.dtype == jnp.bfloat16)
                else jnp.float32)
    itemsize = jnp.dtype(in_dtype).itemsize
    row_mult = 8 if in_dtype == jnp.float32 else 16
    n_pad = _round_up(n, _LANE)
    use_tri = n_pad <= tri_max

    # Row blocking: big blocks (amortize ~0.35us/step + DMA descriptors), >=2 grid
    # steps when the batch allows (v7x megacore), working set under _VMEM_TARGET.
    max_block_rows = max(row_mult, (max_block_rows // row_mult) * row_mult)
    rows = _round_up(b, row_mult)
    num_blocks = max(1, -(-rows // max_block_rows))
    if num_blocks == 1 and rows >= 2 * row_mult:
        num_blocks = 2
    while True:
        block_rows = _round_up(-(-b // num_blocks), row_mult)
        est = (_vmem_estimate(block_rows, n_pad, itemsize, use_tri)
               + 2 * block_rows * block_rows * 4)       # transpose helper temps
        if est <= _VMEM_TARGET or block_rows <= row_mult:
            break
        num_blocks *= 2
    b_pad = block_rows * num_blocks

    def _prep(x):
        x = x.astype(in_dtype)
        if b_pad != b or n_pad != n:     # single pad pass; skipped when aligned
            x = jnp.pad(x, ((0, b_pad - b), (0, n_pad - n)))
        return x

    inputs = [_prep(predict_scores), _prep(scores)]
    in_specs = [pl.BlockSpec((block_rows, n_pad), lambda i: (i, 0)),
                pl.BlockSpec((block_rows, n_pad), lambda i: (i, 0))]
    if use_tri:
        # tri[j, i] = 1 if j <= i, so cpos = posf @ tri is the inclusive prefix
        # count.  Constant index_map -> fetched once, resident across grid steps.
        tri = jnp.triu(jnp.ones((n_pad, n_pad), jnp.bfloat16))
        inputs.append(tri)
        in_specs.append(pl.BlockSpec((n_pad, n_pad), lambda i: (0, 0)))

    out = pl.pallas_call(
        _make_batched_kernel(use_tri),
        out_shape=jax.ShapeDtypeStruct((num_blocks, block_rows), jnp.float32),
        grid_spec=pltpu.PrefetchScalarGridSpec(
            num_scalar_prefetch=0,
            grid=(num_blocks,),
            in_specs=in_specs,
            out_specs=pl.BlockSpec((1, block_rows), lambda i: (i, 0)),
        ),
        compiler_params=pltpu.CompilerParams(
            dimension_semantics=("parallel",),
            vmem_limit_bytes=_vmem_limit(est)),
    )(*inputs)
    # Rows b..b_pad-1 are zero padding (contribute 0); sliced off here.
    return out.reshape(-1)[:b]


def ndcg_loss(predict_score, score, *, fold_rows=8, tri_max=_TRI_MAX_DEFAULT):
    """Single-list API matching NDCGLoss.forward(predict_score, score).

    The list is folded row-major onto `fold_rows` sublanes (full vreg density for
    long lists) with a two-level positive-count scan (intra-row + cross-row carry).
    """
    predict_score = predict_score.reshape(-1)
    score = score.reshape(-1)
    assert predict_score.shape == score.shape
    n = score.shape[0]

    in_dtype = (jnp.bfloat16 if (score.dtype == jnp.bfloat16 and
                                 predict_score.dtype == jnp.bfloat16)
                else jnp.float32)
    itemsize = jnp.dtype(in_dtype).itemsize
    row_mult = 8 if in_dtype == jnp.float32 else 16
    fold_rows = max(row_mult, _round_up(fold_rows, row_mult))
    cols = _round_up(max(1, -(-n // fold_rows)), _LANE)
    total = fold_rows * cols
    use_tri = cols <= tri_max
    # TODO(synk): lists too long for one folded slab in VMEM need a grid over the
    # lane axis with carried (s_sum, P, cpos) state; not implemented here.

    def _prep(x):
        x = x.astype(in_dtype)
        if total != n:
            x = jnp.pad(x, (0, total - n))
        return x.reshape(fold_rows, cols)

    inputs = [_prep(predict_score), _prep(score)]
    in_specs = [pl.BlockSpec((fold_rows, cols), lambda i: (0, 0)),
                pl.BlockSpec((fold_rows, cols), lambda i: (0, 0))]
    if use_tri:
        tri = jnp.triu(jnp.ones((cols, cols), jnp.bfloat16))
        inputs.append(tri)
        in_specs.append(pl.BlockSpec((cols, cols), lambda i: (0, 0)))

    est = _vmem_estimate(fold_rows, cols, itemsize, use_tri)
    out = pl.pallas_call(
        _make_single_kernel(use_tri),
        out_shape=jax.ShapeDtypeStruct((1, 1), jnp.float32),
        grid_spec=pltpu.PrefetchScalarGridSpec(
            num_scalar_prefetch=0,
            grid=(1,),
            in_specs=in_specs,
            out_specs=pl.BlockSpec((1, 1), lambda i: (0, 0)),
        ),
        compiler_params=pltpu.CompilerParams(
            dimension_semantics=("arbitrary",),
            vmem_limit_bytes=_vmem_limit(est)),
    )(*inputs)
    return out[0, 0]


def ref_ndcg(predict_score, score):
    """Pure-numpy port of the PyTorch reference, for verification."""
    score = np.asarray(score, np.float64)
    predict = np.asarray(predict_score, np.float64)
    score = score / score.sum()
    predict = predict / score.sum()
    pos_vals = score[score > 0.0]
    dcgi = [v / np.log2(i + 2) for i, v in enumerate(pos_vals)]
    loss = 0.0
    real_index = [pos_vals.shape[0] + 1, 1]
    pos_idx = set(np.where(score > 0.0)[0].tolist())
    for index, result in enumerate(predict):
        if index not in pos_idx:
            loss += (result / (real_index[0] + 1)) ** 2
            real_index[0] += 1
        else:
            loss += (result / (real_index[1] + 1) - dcgi[real_index[1] - 1]) ** 2
            real_index[1] += 1
    return np.float32(loss)


if __name__ == "__main__":
    key = jax.random.PRNGKey(0)
    ks = jax.random.split(key, 8)

    # 1) single list, tiny (matches NDCGLoss.forward at a small shape)
    n1 = 16
    s1 = jax.random.uniform(ks[0], (n1,), jnp.float32, minval=-0.5, maxval=1.0)
    p1 = jax.random.normal(ks[1], (n1,), jnp.float32)
    l1 = ndcg_loss(p1, s1)
    jax.block_until_ready(l1)
    e1 = ref_ndcg(np.asarray(p1), np.asarray(s1))
    assert np.allclose(np.asarray(l1), e1, rtol=2e-2, atol=1e-5), (float(l1), float(e1))

    # 2) batched lists (B=4, N=24): MXU triangle-scan path, n_pad = 128
    b2, n2 = 4, 24
    s2 = jax.random.uniform(ks[2], (b2, n2), jnp.float32, minval=-0.5, maxval=1.0)
    p2 = jax.random.normal(ks[3], (b2, n2), jnp.float32)
    l2 = ndcg_loss_batched(p2, s2)
    jax.block_until_ready(l2)
    e2 = np.array([ref_ndcg(np.asarray(p2[i]), np.asarray(s2[i])) for i in range(b2)])
    assert np.allclose(np.asarray(l2), e2, rtol=2e-2, atol=1e-5), (np.asarray(l2), e2)

    # 3) batched, N > 128 (n_pad = 384): multi-vreg lanes through the triangle path
    b3, n3 = 4, 300
    s3 = jax.random.uniform(ks[4], (b3, n3), jnp.float32, minval=-0.5, maxval=1.0)
    p3 = jax.random.normal(ks[5], (b3, n3), jnp.float32)
    l3 = ndcg_loss_batched(p3, s3)
    jax.block_until_ready(l3)
    e3 = np.array([ref_ndcg(np.asarray(p3[i]), np.asarray(s3[i])) for i in range(b3)])
    assert np.allclose(np.asarray(l3), e3, rtol=2e-2, atol=1e-5), (np.asarray(l3), e3)

    # 4) same data through the roll-scan fallback (tri_max=0 forces it), which
    #    exercises cross-vreg pltpu.roll shifts (128, 256) flagged in the review.
    l4 = ndcg_loss_batched(p3, s3, tri_max=0)
    jax.block_until_ready(l4)
    assert np.allclose(np.asarray(l4), e3, rtol=2e-2, atol=1e-5), (np.asarray(l4), e3)

    # 5) single long list folded onto 8 sublanes (two-level scan + cross-row carry)
    n5 = 2500
    s5 = jax.random.uniform(ks[6], (n5,), jnp.float32, minval=-0.5, maxval=1.0)
    p5 = jax.random.normal(ks[7], (n5,), jnp.float32)
    l5 = ndcg_loss(p5, s5)
    jax.block_until_ready(l5)
    e5 = ref_ndcg(np.asarray(p5), np.asarray(s5))
    assert np.allclose(np.asarray(l5), e5, rtol=2e-2, atol=1e-5), (float(l5), float(e5))

    print("KERNEL_OK")
</pallas_src>

<mosaic_0001>
module attributes {stable_mosaic.version = 11 : i64} {
  func.func @single_kernel(%arg0: i32, %arg1: memref<8x128xf32, #tpu.memory_space<vmem>>, %arg2: memref<8x128xf32, #tpu.memory_space<vmem>>, %arg3: memref<128x128xbf16, #tpu.memory_space<vmem>>, %arg4: memref<1x1xf32, #tpu.memory_space<vmem>>) attributes {dimension_semantics = [#tpu.dimension_semantics<arbitrary>], iteration_bounds = array<i64: 1>, scalar_prefetch = 0 : i64, scratch_operands = 0 : i64, tpu.core_type = #tpu.core_type<tc>, window_params = [{pipeline_mode = #tpu.pipeline_mode<synchronous>, transform_indices = @transform_0, window_bounds = array<i64: 8, 128>}, {pipeline_mode = #tpu.pipeline_mode<synchronous>, transform_indices = @transform_1, window_bounds = array<i64: 8, 128>}, {pipeline_mode = #tpu.pipeline_mode<synchronous>, transform_indices = @transform_2, window_bounds = array<i64: 128, 128>}, {pipeline_mode = #tpu.pipeline_mode<synchronous>, transform_indices = @transform_3, window_bounds = array<i64: 1, 1>}]} {
    %c0 = arith.constant 0 : index
    %c0_0 = arith.constant 0 : index
    %0 = vector.load %arg2[%c0, %c0_0] : memref<8x128xf32, #tpu.memory_space<vmem>>, vector<8x128xf32>
    %c0_1 = arith.constant 0 : index
    %c0_2 = arith.constant 0 : index
    %1 = vector.load %arg1[%c0_1, %c0_2] : memref<8x128xf32, #tpu.memory_space<vmem>>, vector<8x128xf32>
    %cst = arith.constant dense<0.000000e+00> : vector<8xf32>
    %2 = vector.multi_reduction <add>, %0, %cst [1] : vector<8x128xf32> to vector<8xf32>
    %3 = vector.shape_cast %2 : vector<8xf32> to vector<8x1xf32>
    %cst_3 = arith.constant dense<0.000000e+00> : vector<1xf32>
    %4 = vector.multi_reduction <add>, %3, %cst_3 [0] : vector<8x1xf32> to vector<1xf32>
    %5 = vector.shape_cast %4 : vector<1xf32> to vector<1x1xf32>
    %6 = tpu.reciprocal %5 : vector<1x1xf32> -> vector<1x1xf32>
    %7 = vector.broadcast %6 : vector<1x1xf32> to vector<8x128xf32>
    %8 = arith.mulf %0, %7 : vector<8x128xf32>
    %cst_4 = arith.constant 0.000000e+00 : f32
    %9 = vector.broadcast %cst_4 : f32 to vector<8x128xf32>
    %10 = arith.cmpf ogt, %8, %9 : vector<8x128xf32>
    %11 = arith.extui %10 : vector<8x128xi1> to vector<8x128xi32>
    %12 = arith.sitofp %11 : vector<8x128xi32> to vector<8x128xf32>
    %13 = tpu.iota {dimensions = array<i32: 1>} : vector<8x128xi32>
    %14 = arith.truncf %12 : vector<8x128xf32> to vector<8x128xbf16>
    %c0_5 = arith.constant 0 : index
    %c0_6 = arith.constant 0 : index
    %15 = vector.load %arg3[%c0_5, %c0_6] : memref<128x128xbf16, #tpu.memory_space<vmem>>, vector<128x128xbf16>
    %cst_7 = arith.constant dense<0.000000e+00> : vector<8x128xf32>
    %16 = tpu.matmul %14, %15, %cst_7 {dimension_numbers = #tpu.dot_dimension_numbers<[1], [0], [0], [1], [0, 0, 1, 1], [], []>} : vector<8x128xbf16>, vector<128x128xbf16>, vector<8x128xf32> -> vector<8x128xf32>
    %cst_8 = arith.constant dense<0.000000e+00> : vector<8xf32>
    %17 = vector.multi_reduction <add>, %12, %cst_8 [1] : vector<8x128xf32> to vector<8xf32>
    %18 = vector.shape_cast %17 : vector<8xf32> to vector<8x1xf32>
    %19 = tpu.iota {dimensions = array<i32: 0>} : vector<8x8xi32>
    %20 = tpu.iota {dimensions = array<i32: 1>} : vector<8x8xi32>
    %21 = arith.cmpi eq, %19, %20 : vector<8x8xi32>
    %cst_9 = arith.constant 0.000000e+00 : f32
    %22 = vector.shape_cast %18 : vector<8x1xf32> to vector<8x1xf32>
    %23 = vector.broadcast %22 : vector<8x1xf32> to vector<8x8xf32>
    %24 = vector.broadcast %cst_9 : f32 to vector<8x8xf32>
    %25 = arith.select %21, %23, %24 : vector<8x8xi1>, vector<8x8xf32>
    %cst_10 = arith.constant dense<0.000000e+00> : vector<8xf32>
    %26 = vector.multi_reduction <add>, %25, %cst_10 [0] : vector<8x8xf32> to vector<8xf32>
    %27 = vector.shape_cast %26 : vector<8xf32> to vector<1x8xf32>
    %28 = arith.cmpi slt, %20, %19 : vector<8x8xi32>
    %cst_11 = arith.constant 0.000000e+00 : f32
    %29 = vector.shape_cast %27 : vector<1x8xf32> to vector<1x8xf32>
    %30 = vector.broadcast %29 : vector<1x8xf32> to vector<8x8xf32>
    %31 = vector.broadcast %cst_11 : f32 to vector<8x8xf32>
    %32 = arith.select %28, %30, %31 : vector<8x8xi1>, vector<8x8xf32>
    %cst_12 = arith.constant dense<0.000000e+00> : vector<8xf32>
    %33 = vector.multi_reduction <add>, %32, %cst_12 [1] : vector<8x8xf32> to vector<8xf32>
    %34 = vector.shape_cast %33 : vector<8xf32> to vector<8x1xf32>
    %35 = vector.broadcast %34 : vector<8x1xf32> to vector<8x128xf32>
    %36 = arith.addf %16, %35 : vector<8x128xf32>
    %cst_13 = arith.constant dense<0.000000e+00> : vector<8xf32>
    %37 = vector.multi_reduction <add>, %12, %cst_13 [1] : vector<8x128xf32> to vector<8xf32>
    %38 = vector.shape_cast %37 : vector<8xf32> to vector<8x1xf32>
    %cst_14 = arith.constant dense<0.000000e+00> : vector<1xf32>
    %39 = vector.multi_reduction <add>, %38, %cst_14 [0] : vector<8x1xf32> to vector<1xf32>
    %40 = vector.shape_cast %39 : vector<1xf32> to vector<1x1xf32>
    %41 = tpu.iota {dimensions = array<i32: 0>} : vector<8x128xi32>
    %c128_i32 = arith.constant 128 : i32
    %42 = vector.broadcast %c128_i32 : i32 to vector<8x128xi32>
    %43 = arith.muli %41, %42 : vector<8x128xi32>
    %44 = arith.addi %43, %13 : vector<8x128xi32>
    %45 = arith.sitofp %44 : vector<8x128xi32> to vector<8x128xf32>
    %cst_15 = arith.constant 1.000000e+00 : f32
    %46 = vector.broadcast %cst_15 : f32 to vector<8x128xf32>
    %47 = arith.addf %45, %46 : vector<8x128xf32>
    %48 = arith.subf %47, %36 : vector<8x128xf32>
    %cst_16 = arith.constant 1.000000e+00 : f32
    %49 = vector.broadcast %cst_16 : f32 to vector<8x128xf32>
    %50 = arith.addf %36, %49 : vector<8x128xf32>
    %51 = arith.divf %1, %50 : vector<8x128xf32>
    %cst_17 = arith.constant 1.000000e+00 : f32
    %52 = vector.broadcast %cst_17 : f32 to vector<8x128xf32>
    %53 = arith.addf %36, %52 : vector<8x128xf32>
    %54 = math.log %53 : vector<8x128xf32>
    %cst_18 = arith.constant 2.000000e+00 : f32
    %55 = math.log %cst_18 : f32
    %56 = vector.broadcast %55 : f32 to vector<8x128xf32>
    %57 = arith.divf %54, %56 : vector<8x128xf32>
    %58 = arith.divf %8, %57 : vector<8x128xf32>
    %59 = arith.subf %51, %58 : vector<8x128xf32>
    %60 = arith.mulf %59, %59 : vector<8x128xf32>
    %cst_19 = arith.constant 1.000000e+00 : f32
    %61 = vector.broadcast %cst_19 : f32 to vector<1x1xf32>
    %62 = arith.addf %40, %61 : vector<1x1xf32>
    %63 = vector.broadcast %62 : vector<1x1xf32> to vector<8x128xf32>
    %64 = arith.addf %63, %48 : vector<8x128xf32>
    %65 = tpu.reciprocal %64 {approx = true} : vector<8x128xf32> -> vector<8x128xf32>
    %66 = arith.mulf %1, %65 : vector<8x128xf32>
    %67 = arith.mulf %66, %66 : vector<8x128xf32>
    %68 = arith.select %10, %60, %67 : vector<8x128xi1>, vector<8x128xf32>
    %cst_20 = arith.constant dense<0.000000e+00> : vector<8xf32>
    %69 = vector.multi_reduction <add>, %68, %cst_20 [1] : vector<8x128xf32> to vector<8xf32>
    %70 = vector.shape_cast %69 : vector<8xf32> to vector<8x1xf32>
    %cst_21 = arith.constant dense<0.000000e+00> : vector<1xf32>
    %71 = vector.multi_reduction <add>, %70, %cst_21 [0] : vector<8x1xf32> to vector<1xf32>
    %72 = vector.shape_cast %71 : vector<1xf32> to vector<1x1xf32>
    %c0_22 = arith.constant 0 : index
    %c0_23 = arith.constant 0 : index
    %73 = vector.load %arg4[%c0_22, %c0_23] : memref<1x1xf32, #tpu.memory_space<vmem>>, vector<1x1xf32>
    tpu.vector_store %arg4[%c0_22, %c0_23], %72 {strides = array<i32>} : memref<1x1xf32, #tpu.memory_space<vmem>>, vector<1x1xf32>,
    return
  }
  func.func @transform_0(%arg0: i32) -> (i32, i32) {
    %c0_i32 = arith.constant 0 : i32
    %c0_i32_0 = arith.constant 0 : i32
    %c0_i32_1 = arith.constant 0 : i32
    return %c0_i32, %c0_i32_0 : i32, i32
  }
  func.func @transform_1(%arg0: i32) -> (i32, i32) {
    %c0_i32 = arith.constant 0 : i32
    %c0_i32_0 = arith.constant 0 : i32
    %c0_i32_1 = arith.constant 0 : i32
    return %c0_i32, %c0_i32_0 : i32, i32
  }
  func.func @transform_2(%arg0: i32) -> (i32, i32) {
    %c0_i32 = arith.constant 0 : i32
    %c0_i32_0 = arith.constant 0 : i32
    %c0_i32_1 = arith.constant 0 : i32
    return %c0_i32, %c0_i32_0 : i32, i32
  }
  func.func @transform_3(%arg0: i32) -> (i32, i32) {
    %c0_i32 = arith.constant 0 : i32
    %c0_i32_0 = arith.constant 0 : i32
    %c0_i32_1 = arith.constant 0 : i32
    return %c0_i32, %c0_i32_0 : i32, i32
  }
}

</mosaic_0001>

<bundles_post_ra>
// kernel: tpu_custom_call.1
= control target key start
LH: loop header
LB: loop body
LE: loop exit
PB: predicated region body
PF: predicated region fallthrough
CT: control target
= control target key end

     0   :  { %8 = vsyncpa [#allocation3], 0  ;;  %s453_s0 = inlined_call_operand.hbm [shape: f32[8,128], index: 0, kind: input, shape index: {}]   ;;  %s454_s1 = inlined_call_operand.hbm [shape: f32[8,128], index: 1, kind: input, shape index: {}]   ;;  %s455_s2 = inlined_call_operand.hbm [shape: bf16[128,128], index: 2, kind: input, shape index: {}]   ;;  %s456_s3 = inlined_call_operand.hbm [shape: f32[1,1], index: 3, kind: output, shape index: {}]  }
   0x1   :  { %9 = vsyncpa [#allocation6], 0 }
   0x2   :  { %10 = vsyncpa [#allocation4], 0  ;;  %s401_s12 = smov [#allocation5]   ;;  %s402_s14 = smov [#allocation2]  }
   0x3   :  { %s27_s13 = sshll.u32 %s401_s12, 4  ;;  %s17_s15 = sshll.u32 %s402_s14, 4  ;;  %s28_s13 = int_to_ptr.vmem [resolvable:$true] %s27_s13  ;;  %s18_s15 = int_to_ptr.vmem [resolvable:$true] %s17_s15 }
   0x4   :  { %s323_s16 = scalar_lea.vmem %s28_s13, 128  ;;  %p328_p1 = scmp.lt.s32.totalorder %s28_s13, %s28_s13 }
   0x5   :  { %p324_p0 = scmp.ne.s32.totalorder %s28_s13, %s323_s16  ;;  %p329_p2 = scmp.lt.s32.totalorder %s323_s16, %s323_s16 }
   0x7   :  { %p330_p3 = por %p329_p2, %p328_p1 }
   0x9   :  { %p331_p4 = pnand %p330_p3, %p324_p0 }
   0xb   :  { %334 = shalt.err (!%p331_p4)
}
   0xc   :  { %30 = dma.hbm_to_vmem [thread:$0]  %s454_s1, 128, %s28_s13, [#allocation6]  }
   0xd   :  { %s343_s19 = scalar_lea.vmem %s18_s15, 128  ;;  %p348_p6 = scmp.lt.s32.totalorder %s18_s15, %s18_s15 }
   0xe   :  { %p344_p5 = scmp.ne.s32.totalorder %s18_s15, %s343_s19  ;;  %p349_p7 = scmp.lt.s32.totalorder %s343_s19, %s343_s19 }
  0x10   :  { %p350_p8 = por %p349_p7, %p348_p6 }
  0x12   :  { %p351_p9 = pnand %p350_p8, %p344_p5 }
  0x14   :  { %354 = shalt.err (!%p351_p9)
}
  0x15   :  { %20 = dma.hbm_to_vmem [thread:$0]  %s453_s0, 128, %s18_s15, [#allocation3]  }
  0x16   :  { %s403_s22 = smov [#allocation7]  }
  0x17   :  { %s36_s23 = sshll.u32 %s403_s22, 4  ;;  %s37_s23 = int_to_ptr.vmem [resolvable:$true] %s36_s23 }
  0x18   :  { %s363_s24 = scalar_lea.vmem %s37_s23, 1024  ;;  %p368_p11 = scmp.lt.s32.totalorder %s37_s23, %s37_s23 }
  0x19   :  { %p364_p10 = scmp.ne.s32.totalorder %s37_s23, %s363_s24  ;;  %p369_p12 = scmp.lt.s32.totalorder %s363_s24, %s363_s24 }
  0x1b   :  { %p370_p13 = por %p369_p12, %p368_p11 }
  0x1d   :  { %p371_p0 = pnand %p370_p13, %p364_p10 }
  0x1f   :  { %374 = shalt.err (!%p371_p0)
}
  0x20   :  { %s404_s1 = smov 64   ;;  %s405_s25 = smov 4  }
  0x21   :  { %42 = dma.hbm_to_vmem [thread:$0]  %s455_s2, 1024, %s37_s23, [#allocation6], %s404_s1, %s404_s1, %s405_s25  }
  0x22   :  { %395 = dma.done.wait [#allocation3], 128  }
  0x23   :  { %396 = vsyncadd [#allocation3], 4294967168 }
  0x24   :  { %397 = dma.done.wait [#allocation6], 1152  }
  0x25   :  { %398 = vsyncadd [#allocation6], 4294966144  ;;  %v406_v0 = vmov 0.0   ;;  %v53_v1 = vld [vmem:[#allocation5] sm:$0xff]  ;;  %v298_v3 = vld [vmem:[#allocation7 + $0x30] sm:$0xff]   ;;  %vm407_vm0 = vmmov 0   ;;  %v68_v21 = vlaneseq }
  0x26   :  { %268 = vmatprep.subr.bf16.mxu0 %v406_v0  ;;  %55 = vadd.xlane.f32.xlu0 %v53_v1  ;;  %v297_v2 = vld [vmem:[#allocation7 + $0x38] sm:$0xff]   ;;  %v299_v4 = vld [vmem:[#allocation7 + $0x28] sm:$0xff]   ;;  %v300_v5 = vld [vmem:[#allocation7 + $0x20] sm:$0xff]   ;;  %v408_v20 = vmov 1.0|1.0   ;;  %vm93_vm4 = vcmask 64512  }
  0x27   :  { %269 = vmatpush3.bf16.msra.mxu0 %v297_v2  ;;  %v301_v6 = vld [vmem:[#allocation7 + $0x18] sm:$0xff]   ;;  %284 = vmatprep.mubr.msk.bf16.mxu0 %vm407_vm0, %v406_v0  ;;  %v302_v7 = vld [vmem:[#allocation7 + $0x10] sm:$0xff]   ;;  %v303_v8 = vld [vmem:[#allocation7 + $0x8] sm:$0xff]   ;;  %v69_v22 = vand.u32 127, %v68_v21  ;;  %v90_v23 = vshrl.u32 %v68_v21, 7  ;;  %s409_s0 = smov [#allocation8]  }
  0x28   :  { %270 = vmatprep.subr.bf16.mxu0 %v406_v0  ;;  %v304_v9 = vld [vmem:[#allocation7] sm:$0xff]   ;;  %v54_v60 = vld [vmem:[#allocation2] sm:$0xff]  ;;  %s238_s2 = sshll.u32 %s409_s0, 4  ;;  %vm230_vm6 = vcmask 0   ;;  %s239_s2 = int_to_ptr.vmem [resolvable:$true] %s238_s2 }
  0x29   :  { %vm91_vm3 = vcmp.eq.s32.totalorder %v90_v23, %v69_v22  ;;  %vm101_vm5 = vcmp.lt.s32.totalorder %v69_v22, %v90_v23  ;;  %v200_v41 = vmul.u32 128, %v90_v23  ;;  %s375_s28 = scalar_lea.vmem %s239_s2, 16  ;;  %s379_s29 = scalar_lea.vmem %s239_s2, 32 }
  0x2a   :  { %p376_p1 = scmp.ne.s32.totalorder %s239_s2, %s375_s28  ;;  %p380_p2 = scmp.lt.s32.totalorder %s239_s2, %s239_s2 }
  0x2b   :  { %271 = vmatpush3.bf16.msra.mxu0 %v298_v3  ;;  %v201_v45 = vadd.s32 %v200_v41, %v69_v22  ;;  %p381_p3 = scmp.lt.s32.totalorder %s379_s29, %s375_s28 }
  0x2c   :  { %272 = vmatprep.subr.bf16.mxu0 %v406_v0 }
  0x2d   :  { %v202_v48 = vcvt.s32.f32 %v201_v45  ;;  %p382_p4 = por %p381_p3, %p380_p2 }
  0x2f   :  { %273 = vmatpush3.bf16.msra.mxu0 %v299_v4  ;;  %v203_v50 = vadd.f32 1.0, %v202_v48  ;;  %p383_p5 = pnand %p382_p4, %p376_p1 }
  0x30   :  { %274 = vmatprep.subr.bf16.mxu0 %v406_v0 }
  0x33   :  { %275 = vmatpush3.bf16.msra.mxu0 %v300_v5 }
  0x34   :  { %276 = vmatprep.subr.bf16.mxu0 %v406_v0 }
  0x37   :  { %277 = vmatpush3.bf16.msra.mxu0 %v301_v6 }
  0x38   :  { %278 = vmatprep.subr.bf16.mxu0 %v406_v0 }
  0x3b   :  { %279 = vmatpush3.bf16.msra.mxu0 %v302_v7 }
  0x3c   :  { %280 = vmatprep.subr.bf16.mxu0 %v406_v0 }
  0x3f   :  { %281 = vmatpush3.bf16.msra.mxu0 %v303_v8 }
  0x40   :  { %282 = vmatprep.subr.bf16.mxu0 %v406_v0 }
  0x43   :  { %283 = vmatpush3.bf16.msra.mxu0 %v304_v9 }
  0xaf   :  { %v56_v10 = vpop.xlane.xlu0 %55 }
  0xb0   :  { %v57_v11 = vrot.slane %v56_v10, 4 }
  0xb2   :  { %v58_v12 = vadd.f32 %v57_v11, %v56_v10 }
  0xb4   :  { %v59_v13 = vrot.slane %v58_v12, 2 }
  0xb6   :  { %v60_v14 = vadd.f32 %v59_v13, %v58_v12 }
  0xb8   :  { %v61_v15 = vrot.slane %v60_v14, 1 }
  0xba   :  { %v62_v16 = vadd.f32 %v61_v15, %v60_v14 }
  0xbc   :  { %305 = vrcp.f32 %v62_v16 }
  0xc9   :  { %v306_v17 = vpop.eup %305 }
  0xca   :  { %v439_v18 = vmul.f32 %v306_v17, %v53_v1 }
  0xcc   :  { %vm65_vm1 = vcmp.gt.f32.partialorder %v439_v18, 0.0 }
  0xcd   :  { %vm257_vm2 = vmpackc.low %vm65_vm1, %vm65_vm1  ;;  %v248_v19 = vsel %vm65_vm1, 1.0, %v406_v0 }
  0xce   :  { %285 = vmatmul.mubr.msk.bf16.vlgmr.msra.gmra.mxu0 %vm257_vm2, %v408_v20  ;;  %87 = vadd.xlane.f32.xlu0 %v248_v19 }
 0x157   :  { %v88_v24 = vpop.xlane.xlu0 %87 }
 0x158   :  { %v92_v25 = vsel %vm91_vm3, %v88_v24, 0.0  ;;  %v194_v39 = vrot.slane %v88_v24, 4 }
 0x159   :  { %v94_v26 = vsel %vm93_vm4, %v92_v25, 0.0 }
 0x15a   :  { %v95_v27 = vrot.slane %v94_v26, 4  ;;  %v195_v40 = vadd.f32 %v194_v39, %v88_v24 }
 0x15c   :  { %v96_v28 = vadd.f32 %v95_v27, %v94_v26  ;;  %v196_v42 = vrot.slane %v195_v40, 2 }
 0x15e   :  { %v97_v29 = vrot.slane %v96_v28, 2  ;;  %v197_v47 = vadd.f32 %v196_v42, %v195_v40 }
 0x160   :  { %v98_v30 = vadd.f32 %v97_v29, %v96_v28  ;;  %v198_v49 = vrot.slane %v197_v47, 1 }
 0x162   :  { %v99_v31 = vrot.slane %v98_v30, 1  ;;  %v199_v51 = vadd.f32 %v198_v49, %v197_v47 }
 0x164   :  { %v100_v32 = vadd.f32 %v99_v31, %v98_v30  ;;  %v216_v53 = vadd.f32 1.0, %v199_v51 }
 0x166   :  { %v102_v33 = vsel %vm101_vm5, %v100_v32, 0.0 }
 0x167   :  { %v103_v34 = vsel %vm93_vm4, %v102_v33, 0.0 }
 0x168   :  { %104 = vadd.xlane.f32.xlu1 %v103_v34 }
 0x18e   :  { %v188_v35 = vpop.f32.mrf.mxu0 }
 0x190   :  { %v286_v36 = vpop.f32.mrf.mxu0 }
 0x192   :  { %v191_v37 = vpop.f32.mrf.mxu0 }
 0x194   :  { %v287_v38 = vpop.f32.mrf.mxu0 }
 0x1f1   :  { %v105_v43 = vpop.xlane.xlu1 %104 }
 0x1f2   :  { %v189_v44 = vadd.f32 %v188_v35, %v105_v43 }
 0x1f4   :  { %v205_v46 = vadd.f32 1.0, %v189_v44  ;;  %v204_v52 = vsub.f32 %v203_v50, %v189_v44 }
 0x1f6   :  { %307 = vlog2.f32 %v205_v46  ;;  %v217_v54 = vadd.f32 %v216_v53, %v204_v52 }
 0x1f7   :  { %309 = vrcp.f32 %v205_v46 }
 0x1f8   :  { %311 = vrcp.f32 %v217_v54 }
 0x203   :  { %v308_v55 = vpop.eup %307 }
 0x204   :  { %v209_v56 = vmul.f32 0.6931472, %v308_v55  ;;  %v310_v58 = vpop.eup %309 }
 0x205   :  { %v312_v59 = vpop.eup %311  ;;  %v207_v62 = vmul.f32 %v310_v58, %v54_v60 }
 0x206   :  { %v211_v57 = vmul.f32 1.442695, %v209_v56  ;;  %v219_v0 = vmul.f32 %v312_v59, %v54_v60 }
 0x208   :  { %313 = vrcp.f32 %v211_v57  ;;  %v220_v3 = vmul.f32 %v219_v0, %v219_v0 }
 0x215   :  { %v314_v61 = vpop.eup %313 }
 0x216   :  { %v213_v63 = vmul.f32 %v314_v61, %v439_v18 }
 0x218   :  { %v214_v1 = vsub.f32 %v207_v62, %v213_v63 }
 0x21a   :  { %v215_v2 = vmul.f32 %v214_v1, %v214_v1 }
 0x21c   :  { %v221_v4 = vsel %vm65_vm1, %v215_v2, %v220_v3 }
 0x21d   :  { %222 = vadd.xlane.f32.xlu1 %v221_v4 }
 0x2a6   :  { %v223_v5 = vpop.xlane.xlu1 %222 }
 0x2a7   :  { %v224_v6 = vrot.slane %v223_v5, 4 }
 0x2a9   :  { %v225_v7 = vadd.f32 %v224_v6, %v223_v5 }
 0x2ab   :  { %v226_v8 = vrot.slane %v225_v7, 2 }
 0x2ad   :  { %v227_v9 = vadd.f32 %v226_v8, %v225_v7 }
 0x2af   :  { %v228_v10 = vrot.slane %v227_v9, 1 }
 0x2b1   :  { %v229_v11 = vadd.f32 %v228_v10, %v227_v9 }
 0x2b3   :  { %231 = vst.msk [vmem:[#allocation8] sm:$0x1] %vm230_vm6, %v229_v11 }
 0x2b4   :  { %386 = shalt.err (!%p383_p5)
}
 0x2b5   :  { %241 = dma.vmem_to_hbm [thread:$0]  %s239_s2, 16, %s456_s3, [#allocation4]  }
 0x2b6   :  { %399 = dma.done.wait [#allocation4], 16  }
 0x2b7   :  { %400 = vsyncadd [#allocation4], 4294967280 }
 0x2b8   :  { %245 = vsyncpa [#allocation3], 1 }
 0x2b9   :  { %246 = vsyncpa [#allocation6], 1 }
 0x2ba   :  { %247 = vsyncpa [#allocation4], 1 }

</bundles_post_ra>
